<compile_context>
chip_gen: v7x
topology: tpu7x:2x2x1
jax: 0.10.0
libtpu: 0.0.40
codegen_flags: <defaults>
</compile_context>

<pallas_src>
import math

import jax
import jax.numpy as jnp
from jax.experimental import pallas as pl
from jax.experimental.pallas import tpu as pltpu


def _round_up(x, m):
    return (x + m - 1) // m * m


def _llama_mlp_kernel(x_ref, wg_ref, wu_ref, wd_ref, o_ref, acc_ref):
    # x_ref:   (m_tile, H)      resident across the inner k axis
    # wg_ref:  (H, i_tile)      gate_proj columns for intermediate slice k
    # wu_ref:  (H, i_tile)      up_proj   columns for intermediate slice k
    # wd_ref:  (i_tile, H)      down_proj rows    for intermediate slice k
    # o_ref:   (m_tile, H)      written once, at the last k
    # acc_ref: (m_tile, H) f32  VMEM accumulator for down_proj
    k = pl.program_id(1)

    @pl.when(k == 0)
    def _zero():
        acc_ref[...] = jnp.zeros_like(acc_ref)

    x = x_ref[...]
    # Two MXU matmuls for this intermediate slice; both accumulate in f32.
    gate = jnp.dot(x, wg_ref[...], preferred_element_type=jnp.float32)
    up = jnp.dot(x, wu_ref[...], preferred_element_type=jnp.float32)
    # SiLU epilogue in f32: sigmoid goes to the EUP, mul to the VPU, so this
    # hides under the MXU work.
    h = (gate * jax.nn.sigmoid(gate)) * up

    wd = wd_ref[...]
    acc_ref[...] += jnp.dot(h.astype(wd.dtype), wd,
                            preferred_element_type=jnp.float32)

    @pl.when(k == pl.num_programs(1) - 1)
    def _store():
        o_ref[...] = acc_ref[...].astype(o_ref.dtype)


def llama_mlp_wrapper(x, wg_t, wu_t, wd_t, *, mini_s=8, chunk_size=4096,
                      chunk_mode=True, m_tile=256, i_tile=512,
                      vmem_budget_bytes=48 << 20):
    """Pallas equivalent of LlamaMLPWarpper.forward.

    x:    [bsz, q_len, hidden]
    wg_t: [hidden, intermediate]   (gate_proj.weight transposed)
    wu_t: [hidden, intermediate]   (up_proj.weight transposed)
    wd_t: [intermediate, hidden]   (down_proj.weight transposed)

    mini_s / chunk_size / chunk_mode are accepted for API parity with the
    PyTorch wrapper only: the MLP is token-wise, so the sequence-chunk loop
    is semantically the identity.  TPU tiles are derived from a VMEM budget
    instead (m_tile rows of the flattened (B*S, H) matrix, i_tile columns of
    the intermediate dimension, both multiples of 128).
    """
    del mini_s, chunk_size, chunk_mode  # host chunking heuristic; see docstring
    bsz, q_len, hidden = x.shape
    inter = wg_t.shape[1]
    assert wg_t.shape == (hidden, inter)
    assert wu_t.shape == (hidden, inter)
    assert wd_t.shape == (inter, hidden)

    # ---- tile sizing (multiples of 128, shrunk to fit the VMEM budget) -----
    m_total = bsz * q_len
    m_tile = min(_round_up(m_tile, 128), _round_up(m_total, 128))
    i_tile = min(_round_up(i_tile, 128), _round_up(inter, 128))

    x_bytes = jnp.dtype(x.dtype).itemsize
    w_bytes = jnp.dtype(wg_t.dtype).itemsize

    def footprint(mt, it):
        return (2 * mt * hidden * x_bytes          # x tile, double buffered
                + 2 * mt * hidden * x_bytes        # out tile, double buffered
                + 2 * 2 * hidden * it * w_bytes    # gate + up tiles, 2 bufs each
                + 2 * it * hidden * w_bytes        # down tile, 2 bufs
                + mt * hidden * 4)                 # f32 accumulator

    while footprint(m_tile, i_tile) > vmem_budget_bytes and i_tile > 128:
        i_tile -= 128
    while footprint(m_tile, i_tile) > vmem_budget_bytes and m_tile > 128:
        m_tile -= 128

    m_pad = _round_up(m_total, m_tile)
    n_m = m_pad // m_tile
    i_pad = _round_up(inter, i_tile)
    n_k = i_pad // i_tile

    # ---- operand prep (wrapper-side, no weight repacking/duplication) ------
    x2 = x.reshape(m_total, hidden)
    if m_pad != m_total:
        x2 = jnp.pad(x2, ((0, m_pad - m_total), (0, 0)))

    if i_pad != inter:
        # Zero padding of the intermediate dim contributes exactly 0 to the
        # down_proj accumulation (silu(0) * 0 = 0, padded down rows are 0).
        wg_p = jnp.pad(wg_t, ((0, 0), (0, i_pad - inter)))
        wu_p = jnp.pad(wu_t, ((0, 0), (0, i_pad - inter)))
        wd_p = jnp.pad(wd_t, ((0, i_pad - inter), (0, 0)))
    else:
        wg_p, wu_p, wd_p = wg_t, wu_t, wd_t

    # ---- VMEM limit: footprint + headroom, capped for v7x's 64 MiB ---------
    vmem_limit = int(min(max(footprint(m_tile, i_tile) + (8 << 20), 32 << 20),
                         64 << 20))

    cost = pl.CostEstimate(
        flops=6 * m_total * hidden * inter,        # gate + up + down matmuls
        transcendentals=m_total * inter,           # sigmoid
        bytes_accessed=(x2.size * x_bytes
                        + wg_p.size * w_bytes + wu_p.size * w_bytes
                        + wd_p.size * w_bytes
                        + m_pad * hidden * x_bytes),
    )

    grid_spec = pltpu.PrefetchScalarGridSpec(
        num_scalar_prefetch=0,
        grid=(n_m, n_k),
        in_specs=[
            # x tile stays resident across the inner (intermediate) axis.
            pl.BlockSpec((m_tile, hidden), lambda m, k: (m, 0)),
            # Streamed gate / up / down weight tiles for intermediate slice k.
            pl.BlockSpec((hidden, i_tile), lambda m, k: (0, k)),
            pl.BlockSpec((hidden, i_tile), lambda m, k: (0, k)),
            pl.BlockSpec((i_tile, hidden), lambda m, k: (k, 0)),
        ],
        out_specs=pl.BlockSpec((m_tile, hidden), lambda m, k: (m, 0)),
        scratch_shapes=[pltpu.VMEM((m_tile, hidden), jnp.float32)],
    )

    out2 = pl.pallas_call(
        _llama_mlp_kernel,
        out_shape=jax.ShapeDtypeStruct((m_pad, hidden), x.dtype),
        grid_spec=grid_spec,
        compiler_params=pltpu.CompilerParams(
            dimension_semantics=("parallel", "arbitrary"),
            vmem_limit_bytes=vmem_limit),
        cost_estimate=cost,
    )(x2, wg_p, wu_p, wd_p)

    return out2[:m_total].reshape(bsz, q_len, hidden)


def _reference(x, wg_t, wu_t, wd_t):
    gate = jnp.einsum("bsh,hi->bsi", x, wg_t)
    up = jnp.einsum("bsh,hi->bsi", x, wu_t)
    h = jax.nn.silu(gate) * up
    return jnp.einsum("bsi,ih->bsh", h, wd_t)


if __name__ == "__main__":
    # Small, MXU/VPU-friendly shapes consistent with the module's forward.
    bsz, q_len, hidden, inter = 2, 64, 128, 256

    key = jax.random.PRNGKey(0)
    kx, kg, ku, kd = jax.random.split(key, 4)

    x = jax.random.normal(kx, (bsz, q_len, hidden), dtype=jnp.float32)
    # PyTorch nn.Linear weights are [out, in]; store transposed ([in, out]).
    scale_h = 1.0 / math.sqrt(hidden)
    scale_i = 1.0 / math.sqrt(inter)
    wg_t = jax.random.uniform(kg, (hidden, inter), jnp.float32, -scale_h, scale_h)
    wu_t = jax.random.uniform(ku, (hidden, inter), jnp.float32, -scale_h, scale_h)
    wd_t = jax.random.uniform(kd, (inter, hidden), jnp.float32, -scale_i, scale_i)

    # i_tile=128 -> two intermediate tiles, exercising the accumulator path.
    out = llama_mlp_wrapper(x, wg_t, wu_t, wd_t, m_tile=128, i_tile=128)
    out = jax.block_until_ready(out)

    ref = _reference(x, wg_t, wu_t, wd_t)
    assert out.shape == (bsz, q_len, hidden)
    assert jnp.allclose(out, ref, atol=1e-4, rtol=1e-4), (
        float(jnp.max(jnp.abs(out - ref))))

    print("KERNEL_OK")
</pallas_src>

<mosaic_0001>
module attributes {stable_mosaic.version = 11 : i64} {
  func.func @_llama_mlp_kernel(%arg0: i32, %arg1: i32, %arg2: memref<128x128xf32, #tpu.memory_space<vmem>>, %arg3: memref<128x128xf32, #tpu.memory_space<vmem>>, %arg4: memref<128x128xf32, #tpu.memory_space<vmem>>, %arg5: memref<128x128xf32, #tpu.memory_space<vmem>>, %arg6: memref<128x128xf32, #tpu.memory_space<vmem>>, %arg7: memref<128x128xf32, #tpu.memory_space<vmem>>) attributes {dimension_semantics = [#tpu.dimension_semantics<parallel>, #tpu.dimension_semantics<arbitrary>], iteration_bounds = array<i64: 1, 2>, scalar_prefetch = 0 : i64, scratch_operands = 1 : i64, tpu.core_type = #tpu.core_type<tc>, window_params = [{transform_indices = @transform_0, window_bounds = array<i64: 128, 128>}, {transform_indices = @transform_1, window_bounds = array<i64: 128, 128>}, {transform_indices = @transform_2, window_bounds = array<i64: 128, 128>}, {transform_indices = @transform_3, window_bounds = array<i64: 128, 128>}, {transform_indices = @transform_4, window_bounds = array<i64: 128, 128>}]} {
    %c0_i32 = arith.constant 0 : i32
    %0 = arith.cmpi eq, %arg1, %c0_i32 : i32
    %1 = arith.extui %0 : i1 to i32
    %c0_i32_0 = arith.constant 0 : i32
    %2 = arith.cmpi ne, %1, %c0_i32_0 : i32
    scf.if %2 {
      %cst_16 = arith.constant 0.000000e+00 : f32
      %23 = vector.broadcast %cst_16 : f32 to vector<128x128xf32>
      %c0_17 = arith.constant 0 : index
      %c0_18 = arith.constant 0 : index
      %24 = vector.load %arg7[%c0_17, %c0_18] : memref<128x128xf32, #tpu.memory_space<vmem>>, vector<128x128xf32>
      tpu.vector_store %arg7[%c0_17, %c0_18], %23 {strides = array<i32>} : memref<128x128xf32, #tpu.memory_space<vmem>>, vector<128x128xf32>,
    } else {
    }
    %c0 = arith.constant 0 : index
    %c0_1 = arith.constant 0 : index
    %3 = vector.load %arg2[%c0, %c0_1] : memref<128x128xf32, #tpu.memory_space<vmem>>, vector<128x128xf32>
    %c0_2 = arith.constant 0 : index
    %c0_3 = arith.constant 0 : index
    %4 = vector.load %arg3[%c0_2, %c0_3] : memref<128x128xf32, #tpu.memory_space<vmem>>, vector<128x128xf32>
    %cst = arith.constant dense<0.000000e+00> : vector<128x128xf32>
    %5 = tpu.matmul %3, %4, %cst {dimension_numbers = #tpu.dot_dimension_numbers<[1], [0], [0], [1], [0, 0, 1, 1], [], []>} : vector<128x128xf32>, vector<128x128xf32>, vector<128x128xf32> -> vector<128x128xf32>
    %c0_4 = arith.constant 0 : index
    %c0_5 = arith.constant 0 : index
    %6 = vector.load %arg4[%c0_4, %c0_5] : memref<128x128xf32, #tpu.memory_space<vmem>>, vector<128x128xf32>
    %cst_6 = arith.constant dense<0.000000e+00> : vector<128x128xf32>
    %7 = tpu.matmul %3, %6, %cst_6 {dimension_numbers = #tpu.dot_dimension_numbers<[1], [0], [0], [1], [0, 0, 1, 1], [], []>} : vector<128x128xf32>, vector<128x128xf32>, vector<128x128xf32> -> vector<128x128xf32>
    %8 = arith.negf %5 : vector<128x128xf32>
    %9 = math.exp %8 : vector<128x128xf32>
    %cst_7 = arith.constant 1.000000e+00 : f32
    %10 = vector.broadcast %cst_7 : f32 to vector<128x128xf32>
    %11 = arith.addf %10, %9 : vector<128x128xf32>
    %12 = arith.divf %10, %11 : vector<128x128xf32>
    %13 = arith.mulf %5, %12 : vector<128x128xf32>
    %14 = arith.mulf %13, %7 : vector<128x128xf32>
    %c0_8 = arith.constant 0 : index
    %c0_9 = arith.constant 0 : index
    %15 = vector.load %arg5[%c0_8, %c0_9] : memref<128x128xf32, #tpu.memory_space<vmem>>, vector<128x128xf32>
    %c0_10 = arith.constant 0 : index
    %c0_11 = arith.constant 0 : index
    %16 = vector.load %arg7[%c0_10, %c0_11] : memref<128x128xf32, #tpu.memory_space<vmem>>, vector<128x128xf32>
    %cst_12 = arith.constant dense<0.000000e+00> : vector<128x128xf32>
    %17 = tpu.matmul %14, %15, %cst_12 {dimension_numbers = #tpu.dot_dimension_numbers<[1], [0], [0], [1], [0, 0, 1, 1], [], []>} : vector<128x128xf32>, vector<128x128xf32>, vector<128x128xf32> -> vector<128x128xf32>
    %18 = arith.addf %16, %17 : vector<128x128xf32>
    %c0_13 = arith.constant 0 : index
    %c0_14 = arith.constant 0 : index
    %19 = vector.load %arg7[%c0_13, %c0_14] : memref<128x128xf32, #tpu.memory_space<vmem>>, vector<128x128xf32>
    tpu.vector_store %arg7[%c0_13, %c0_14], %18 {strides = array<i32>} : memref<128x128xf32, #tpu.memory_space<vmem>>, vector<128x128xf32>,
    %c1_i32 = arith.constant 1 : i32
    %20 = arith.cmpi eq, %arg1, %c1_i32 : i32
    %21 = arith.extui %20 : i1 to i32
    %c0_i32_15 = arith.constant 0 : i32
    %22 = arith.cmpi ne, %21, %c0_i32_15 : i32
    scf.if %22 {
      %c0_16 = arith.constant 0 : index
      %c0_17 = arith.constant 0 : index
      %23 = vector.load %arg7[%c0_16, %c0_17] : memref<128x128xf32, #tpu.memory_space<vmem>>, vector<128x128xf32>
      %c0_18 = arith.constant 0 : index
      %c0_19 = arith.constant 0 : index
      %24 = vector.load %arg6[%c0_18, %c0_19] : memref<128x128xf32, #tpu.memory_space<vmem>>, vector<128x128xf32>
      tpu.vector_store %arg6[%c0_18, %c0_19], %23 {strides = array<i32>} : memref<128x128xf32, #tpu.memory_space<vmem>>, vector<128x128xf32>,
    } else {
    }
    return
  }
  func.func @transform_0(%arg0: i32, %arg1: i32) -> (i32, i32) {
    %c0_i32 = arith.constant 0 : i32
    %c0_i32_0 = arith.constant 0 : i32
    return %arg0, %c0_i32 : i32, i32
  }
  func.func @transform_1(%arg0: i32, %arg1: i32) -> (i32, i32) {
    %c0_i32 = arith.constant 0 : i32
    %c0_i32_0 = arith.constant 0 : i32
    return %c0_i32, %arg1 : i32, i32
  }
  func.func @transform_2(%arg0: i32, %arg1: i32) -> (i32, i32) {
    %c0_i32 = arith.constant 0 : i32
    %c0_i32_0 = arith.constant 0 : i32
    return %c0_i32, %arg1 : i32, i32
  }
  func.func @transform_3(%arg0: i32, %arg1: i32) -> (i32, i32) {
    %c0_i32 = arith.constant 0 : i32
    %c0_i32_0 = arith.constant 0 : i32
    return %arg1, %c0_i32 : i32, i32
  }
  func.func @transform_4(%arg0: i32, %arg1: i32) -> (i32, i32) {
    %c0_i32 = arith.constant 0 : i32
    %c0_i32_0 = arith.constant 0 : i32
    return %arg0, %c0_i32 : i32, i32
  }
}

</mosaic_0001>

<bundles_post_ra>
// kernel: tpu_custom_call.1
= control target key start
LH: loop header
LB: loop body
LE: loop exit
PB: predicated region body
PF: predicated region fallthrough
CT: control target
= control target key end

     0   :  { %s2444_s0 = inlined_call_operand.hbm [shape: f32[128,128], index: 0, kind: input, shape index: {}]   ;;  %s2445_s1 = inlined_call_operand.hbm [shape: f32[128,256], index: 1, kind: input, shape index: {}]   ;;  %s2446_s2 = inlined_call_operand.hbm [shape: f32[128,256], index: 2, kind: input, shape index: {}]   ;;  %s2447_s3 = inlined_call_operand.hbm [shape: f32[256,128], index: 3, kind: input, shape index: {}]   ;;  %s2448_s4 = inlined_call_operand.hbm [shape: f32[128,128], index: 4, kind: output, shape index: {}]  }
   0x1   :  { %2460 = sst [smem:[#allocation16_spill]] %s2445_s1 }
   0x2   :  { %2461 = sst [smem:[#allocation17_spill]] %s2446_s2 }
   0x3   :  { %9 = vsyncpa [#allocation4], 0 }
   0x4   :  { %10 = vsyncpa [#allocation7], 0 }
   0x5   :  { %12 = vsyncpa [#allocation7 + $0x1], 0 }
   0x6   :  { %13 = vsyncpa [#allocation10], 0 }
   0x7   :  { %15 = vsyncpa [#allocation10 + $0x1], 0 }
   0x8   :  { %16 = vsyncpa [#allocation5], 0  ;;  %s1995_s15 = smov 0   ;;  %s1997_s16 = smov 0  }
   0x9   :  { %s1999_s17 = smov 0   ;;  %s2001_s18 = smov 0  }
   0xa   :  { %s2003_s19 = smov 0   ;;  %s2005_s20 = smov 0  }
   0xb LB: > { %s31_s21 = sadd.s32 1, %s1953_s19  ;;  %s67_s22 = sadd.s32 1, %s1945_s17  ;;  %s1957_s20 = sphi %s2005_s20, %s22_s20   ;;  %s1953_s19 = sphi %s2003_s19, %s2484_s19   ;;  %s1949_s18 = sphi %s2001_s18, %s2483_s18   ;;  %s1945_s17 = sphi %s1999_s17, %s2482_s17   ;;  %s1941_s16 = sphi %s1997_s16, %s2481_s16   ;;  %s1937_s15 = sphi %s1995_s15, %s2480_s15  }
   0xc   : > { %p32_p0 = scmp.ge.s32.totalorder %s31_s21, 2  ;;  %p74_p1 = scmp.ne.s32.totalorder %s1945_s17, %s1941_s16 }
   0xd   : > { %p75_p2 = scmp.eq.s32.totalorder %s1957_s20, 0  ;;  %p1627_p5 = scmp.lt.s32.totalorder %s1957_s20, 2 }
   0xe   : > { %s2486_s21 = smov (%p32_p0, %s31_s21), 0  ;;  %s198_s25 = sand.u32 1, %s1957_s20  }
   0xf   : > { %p2032_p3 = por %p75_p2, %p74_p1  ;;  %s64_s24 = ssub.s32 %s1953_s19, %s2486_s21 }
  0x10   : > { %p65_p4 = scmp.eq.s32.totalorder %s64_s24, 0  ;;  %s2449_s26 = sand.u32 1, %s1945_s17  }
  0x11   : > { %s2046_s28 = sshll.u32 %s2449_s26, 7  ;;  %s1188_s29 = sshll.u32 %s1953_s19, 7 }
  0x12   : > { %s2042_s27 = scalar_select %p65_p4, %s1945_s17, %s67_s22  }
  0x13   : > { %s2463_s1 = sld [smem:[#allocation16_spill]]  ;;  %s202_s7 = scalar_lea.vmem [#allocation6], %s2046_s28 }
  0x14   : > { %s208_s8 = sshll.u32 %s202_s7, 4  ;;  %p2059_p6 = pnand %p1627_p5, %p2032_p3  ;;  %s2055_s8 = int_to_ptr.vmem [resolvable:$true] %s208_s8 }
  0x15   : > { %s2465_s2 = sld [smem:[#allocation17_spill]]  ;;  %s2068_s13 = scalar_lea.sflag [#allocation7], %s198_s25 }
  0x16   : > { %s2464_s9 = scalar_select %p2059_p6, 1, 0 }
  0x17   : > { %p2074_p8 = pneg %p2059_p6 }
  0x19   : > { %s2052_s6 = scalar_lea.hbm %s2463_s1, %s1188_s29  ;;  %s1756_s30 = scalar_lea.hbm %s2463_s1, 4096 }
  0x1a   : > { %s1751_s14 = scalar_lea.hbm %s2052_s6, 2048  ;;  %p1757_p11 = scmp.lt.u32.totalorder %s2052_s6, %s2463_s1 }
  0x1b   : > { %s2066_s12 = scalar_lea.hbm %s2465_s2, %s1188_s29  ;;  %p1752_p7 = scmp.ne.s32.totalorder %s2052_s6, %s1751_s14 }
  0x1c   : > { %s2466_s22 = scalar_select %p2074_p8, 1, 0 }
  0x1d   : > { %p1754_p9 = pnand %p2074_p8, %p1752_p7  ;;  %p1758_p12 = scmp.lt.u32.totalorder %s1756_s30, %s1751_s14 }
  0x1e   : > { %p1760_p0 = scmp.lt.u32.totalorder %s1751_s14, %s2052_s6 }
  0x1f   : > { %p1755_p10 = pneg %p1754_p9  ;;  %p1759_p13 = por %p1758_p12, %p1757_p11 }
  0x21   : > { %p1761_p1 = por %p1760_p0, %p1759_p13 }
  0x23   : > { %p1762_p2 = pnand %p1761_p1, %p1755_p10 }
  0x25   : > { %1765 = shalt.err (!%p1762_p2)
}
  0x26   : > { %s1766_s25 = scalar_lea.vmem %s2055_s8, 2048  ;;  %s1959_s7 = smov [#allocation6]  }
  0x27   : > { %p1767_p3 = scmp.ne.s32.totalorder %s2055_s8, %s1766_s25  ;;  %s1771_s10 = sshll.u32 %s1959_s7, 4  ;;  %s1772_s10 = int_to_ptr.vmem [resolvable:$false] %s1771_s10 }
  0x28   : > { %s1773_s11 = scalar_lea.vmem %s1772_s10, 4096  ;;  %p1774_p7 = scmp.lt.s32.totalorder %s2055_s8, %s1772_s10 }
  0x29   : > { %p1769_p4 = pnand %p1767_p3, %p2074_p8  ;;  %p1775_p9 = scmp.lt.s32.totalorder %s1773_s11, %s1766_s25 }
  0x2b   : > { %p1770_p5 = pneg %p1769_p4  ;;  %p1776_p11 = por %p1775_p9, %p1774_p7 }
  0x2d   : > { %p1777_p12 = pnand %p1776_p11, %p1770_p5 }
  0x2f   : > { %1780 = shalt.err (!%p1777_p12)
}
  0x30   : > { %s2450_s14 = smov 256   ;;  %s2451_s23 = smov 128  }
  0x31   : > { %s1962_s24 = smov 8   ;;  %s2102_s30 = sadd.s32 4294967295, %s1957_s20  }
  0x32   : > { %1619 = dma.hbm_to_vmem [thread:$0]  (!%p2059_p6), %s2052_s6, 2048, %s2055_s8, %s2068_s13, %s2450_s14, %s2451_s23, %s1962_s24  }
  0x33   : > { %p80_p10 = scmp.ne.s32.totalorder %s1941_s16, %s1937_s15  ;;  %p2453_p13 = scmp.eq.s32.totalorder %s2102_s30, 0 }
  0x34   : > { %p1184_p0 = scmp.ge.s32.totalorder %s1957_s20, 1  ;;  %p169_p1 = scmp.lt.s32.totalorder %s1957_s20, 3 }
  0x35   : > { %p2111_p2 = por %p2453_p13, %p80_p10  ;;  %s1963_s8 = smov [#allocation3]  }
  0x36   : > { %p2115_p3 = pnand %p1184_p0, %p169_p1  ;;  %s184_s29 = sshll.u32 %s1963_s8, 4  ;;  %s2121_s29 = int_to_ptr.vmem [resolvable:$true] %s184_s29 }
  0x37   : > { %s2467_s5 = scalar_select %p2111_p2, 1, 0 }
  0x38   : > { %s2468_s6 = scalar_select %p2115_p3, 1, 0 }
  0x39   : > { %p1612_p4 = pneg %p2115_p3  ;;  %s222_s15 = scalar_lea.vmem [#allocation8], %s2046_s28 }
  0x3a   : > { %s228_s25 = sshll.u32 %s222_s15, 4  ;;  %s1781_s10 = scalar_lea.hbm %s2066_s12, 2048  ;;  %s2130_s25 = int_to_ptr.vmem [resolvable:$true] %s228_s25 }
  0x3b   : > { %p2126_p5 = pnand %p1612_p4, %p2453_p13  ;;  %p1782_p7 = scmp.ne.s32.totalorder %s2066_s12, %s1781_s10 }
  0x3c   : > { %s1786_s26 = scalar_lea.hbm %s2465_s2, 4096  ;;  %p1787_p12 = scmp.lt.u32.totalorder %s2066_s12, %s2465_s2 }
  0x3d   : > { %s2469_s7 = scalar_select %p2126_p5, 1, 0 }
  0x3e   : > { %p1784_p9 = pnand %p1782_p7, %p2074_p8  ;;  %p1788_p10 = scmp.lt.u32.totalorder %s1786_s26, %s1781_s10 }
  0x3f   : > { %p1790_p1 = scmp.lt.u32.totalorder %s1781_s10, %s2066_s12 }
  0x40   : > { %p1785_p11 = pneg %p1784_p9  ;;  %p1789_p0 = por %p1788_p10, %p1787_p12 }
  0x42   : > { %p1791_p4 = por %p1790_p1, %p1789_p0 }
  0x44   : > { %p1792_p13 = pnand %p1791_p4, %p1785_p11 }
  0x46   : > { %1795 = shalt.err (!%p1792_p13)
}
  0x47   : > { %s1796_s15 = scalar_lea.vmem %s2130_s25, 2048  ;;  %s1964_s11 = smov [#allocation8]  }
  0x48   : > { %p1797_p7 = scmp.ne.s32.totalorder %s2130_s25, %s1796_s15  ;;  %s1801_s8 = sshll.u32 %s1964_s11, 4  ;;  %s1802_s8 = int_to_ptr.vmem [resolvable:$false] %s1801_s8 }
  0x49   : > { %s1803_s14 = scalar_lea.vmem %s1802_s8, 4096  ;;  %p1804_p3 = scmp.lt.s32.totalorder %s2130_s25, %s1802_s8 }
  0x4a   : > { %p1799_p9 = pnand %p1797_p7, %p2074_p8  ;;  %p1805_p5 = scmp.lt.s32.totalorder %s1803_s14, %s1796_s15 }
  0x4c   : > { %p1800_p2 = pneg %p1799_p9  ;;  %p1806_p12 = por %p1805_p5, %p1804_p3 }
  0x4e   : > { %p1807_p10 = pnand %p1806_p12, %p1800_p2 }
  0x50   : > { %1810 = shalt.err (!%p1807_p10)
}
  0x51   : > { %s2470_s26 = smov 128   ;;  %s2471_s23 = smov 256  }
  0x52   : > { %1622 = dma.hbm_to_vmem [thread:$0]  (!%p2059_p6), %s2066_s12, 2048, %s2130_s25, %s2068_s13, %s2471_s23, %s2470_s26, %s1962_s24  }
  0x53   : > { %s1811_s11 = scalar_lea.hbm %s2444_s0, 2048  ;;  %p2472_p2 = scmp.ne.s32.totalorder %s2469_s7, 0 }
  0x54   : > { %p1812_p13 = scmp.ne.s32.totalorder %s2444_s0, %s1811_s11  ;;  %p1818_p0 = scmp.lt.u32.totalorder %s1811_s11, %s2444_s0 }
  0x55   : > { %p1813_p3 = pneg %p2472_p2 }
  0x57   : > { %p1814_p5 = pnand %p1813_p3, %p1812_p13 }
  0x59   : > { %p1815_p11 = pneg %p1814_p5 }
  0x5b   : > { %p1820_p1 = pnand %p1818_p0, %p1815_p11 }
  0x5d   : > { %1823 = shalt.err (!%p1820_p1)
}
  0x5e   : > { %s1824_s12 = scalar_lea.vmem %s2121_s29, 2048  ;;  %p1832_p12 = scmp.lt.s32.totalorder %s2121_s29, %s2121_s29 }
  0x5f   : > { %p1825_p4 = scmp.ne.s32.totalorder %s2121_s29, %s1824_s12  ;;  %p1833_p10 = scmp.lt.s32.totalorder %s1824_s12, %s1824_s12 }
  0x61   : > { %p1827_p7 = pnand %p1825_p4, %p1813_p3  ;;  %p1834_p6 = por %p1833_p10, %p1832_p12 }
  0x63   : > { %p1828_p9 = pneg %p1827_p7 }
  0x65   : > { %p1835_p8 = pnand %p1834_p6, %p1828_p9 }
  0x67   : > { %1838 = shalt.err (!%p1835_p8)
}
  0x68   : > { %1615 = dma.hbm_to_vmem [thread:$0]  (!%p2472_p2), %s2444_s0, 2048, %s2121_s29, [#allocation4], %s2470_s26, %s2470_s26, %s1962_s24  }
  0x69   : > { %s1221_s13 = sshll.u32 %s1953_s19, 11  ;;  %s242_s25 = scalar_lea.vmem [#allocation9], %s2046_s28 }
  0x6a   : > { %s249_s23 = sshll.u32 %s242_s25, 4  ;;  %s2186_s8 = scalar_lea.hbm %s2447_s3, %s1221_s13  ;;  %s2188_s23 = int_to_ptr.vmem [resolvable:$true] %s249_s23 }
  0x6b   : > { %s2473_s7 = sand.u32 1, %s1945_s17   ;;  %s1839_s14 = scalar_lea.hbm %s2186_s8, 2048 }
  0x6c   : > { %s2192_s15 = scalar_lea.sflag [#allocation10], %s2473_s7  ;;  %p1840_p6 = scmp.ne.s32.totalorder %s2186_s8, %s1839_s14 }
  0x6d   : > { %p2474_p8 = scmp.ne.s32.totalorder %s2466_s22, 0  ;;  %s1844_s12 = scalar_lea.hbm %s2447_s3, 4096 }
  0x6e   : > { %p1845_p3 = scmp.lt.u32.totalorder %s2186_s8, %s2447_s3  ;;  %p1846_p5 = scmp.lt.u32.totalorder %s1844_s12, %s1839_s14 }
  0x6f   : > { %p1842_p13 = pnand %p1840_p6, %p2474_p8  ;;  %p1848_p0 = scmp.lt.u32.totalorder %s1839_s14, %s2186_s8 }
  0x70   : > { %p1847_p11 = por %p1846_p5, %p1845_p3 }
  0x71   : > { %p1843_p2 = pneg %p1842_p13 }
  0x72   : > { %p1849_p1 = por %p1848_p0, %p1847_p11 }
  0x74   : > { %p1850_p4 = pnand %p1849_p1, %p1843_p2 }
  0x76   : > { %1853 = shalt.err (!%p1850_p4)
}
  0x77   : > { %s1854_s13 = scalar_lea.vmem %s2188_s23, 2048  ;;  %s1965_s25 = smov [#allocation9]  }
  0x78   : > { %p1855_p7 = scmp.ne.s32.totalorder %s2188_s23, %s1854_s13  ;;  %s1859_s10 = sshll.u32 %s1965_s25, 4  ;;  %s1860_s10 = int_to_ptr.vmem [resolvable:$false] %s1859_s10 }
  0x79   : > { %s1861_s11 = scalar_lea.vmem %s1860_s10, 4096  ;;  %p1862_p10 = scmp.lt.s32.totalorder %s2188_s23, %s1860_s10 }
  0x7a   : > { %p1857_p9 = pnand %p1855_p7, %p2474_p8  ;;  %p1863_p6 = scmp.lt.s32.totalorder %s1861_s11, %s1854_s13 }
  0x7c   : > { %p1858_p12 = pneg %p1857_p9  ;;  %p1864_p13 = por %p1863_p6, %p1862_p10 }
  0x7e   : > { %p1865_p3 = pnand %p1864_p13, %p1858_p12 }
  0x80   : > { %1868 = shalt.err (!%p1865_p3)
}
  0x81   : > { %p2475_p2 = scmp.ne.s32.totalorder %s2464_s9, 0  ;;  %p2476_p8 = scmp.ne.s32.totalorder %s2468_s6, 0 }
  0x82   : > { %p2477_p5 = scmp.eq.s32.totalorder (!%p2476_p8), %s2102_s30, 0 }
  0x83   : > { %1625 = dma.hbm_to_vmem [thread:$0]  (!%p2475_p2), %s2186_s8, 2048, %s2188_s23, %s2192_s15, %s2470_s26, %s2470_s26, %s1962_s24  }
  0x84   : > { %261 = sbr.rel (%p2476_p8) target bundleno = 717 (0x2cd), region = 36 }
  0x8b   : > { %1920 = dma.done.wait (%p2477_p5), [#allocation4], 2048   ;;  %p2478_p11 = pmov %p2477_p5 }
  0x8c   : > { %s267_s9 = sand.u32 1, %s2102_s30   ;;  %s269_s22 = sand.u32 1, %s1941_s16  }
  0x8d   : > { %1922 = vsyncadd (%p2478_p11), [#allocation4], 4294965248  ;;  %s1196_s7 = sshll.u32 %s269_s22, 7  ;;  %s268_s14 = scalar_lea.sflag [#allocation7], %s267_s9 }
  0x8e   : > { %s2227_s28 = scalar_lea.vmem [#allocation6], %s1196_s7  ;;  %p2479_p0 = scmp.ne.s32.totalorder %s2467_s5, 0 }
  0x90   : > { %1924 = dma.done.wait (%p2479_p0), %s268_s14, 4096  }
  0x91   : > { %1926 = vsyncadd (%p2479_p0), %s268_s14, 4294963200  ;;  %s2233_s24 = scalar_lea.vmem [#allocation8], %s1196_s7  ;;  %s286_s6 = scalar_lea.sflag [#allocation10], %s269_s22 }
  0x92   : > { %s2235_s26 = scalar_lea.vmem [#allocation9], %s1196_s7 }
  0x93   : > { %1928 = dma.done.wait (%p2479_p0), %s286_s6, 2048  }
  0x94   : > { %1930 = vsyncadd (%p2479_p0), %s286_s6, 4294965248  ;;  %p1199_p1 = scmp.ne.s32.totalorder %s1949_s18, 0 }
  0x95   : > { %v1966_v0 = vmov (!%p1199_p1), 0.0  }
  0x96   : > { %325 = sbr.rel (%p1199_p1) target bundleno = 158 (0x9e), region = 56  ;;  %326 = vst [vmem:[#allocation2] sm:$0xff] (!%p1199_p1), %v1966_v0  ;;  %327 = vst [vmem:[#allocation2 + $0x8] sm:$0xff] (!%p1199_p1), %v1966_v0 }
  0x97   : > { %328 = vst [vmem:[#allocation2 + $0x10] sm:$0xff] (!%p1199_p1), %v1966_v0  ;;  %329 = vst [vmem:[#allocation2 + $0x18] sm:$0xff] (!%p1199_p1), %v1966_v0 }
  0x98   : > { %330 = vst [vmem:[#allocation2 + $0x20] sm:$0xff] (!%p1199_p1), %v1966_v0  ;;  %331 = vst [vmem:[#allocation2 + $0x28] sm:$0xff] (!%p1199_p1), %v1966_v0 }
  0x99   : > { %332 = vst [vmem:[#allocation2 + $0x30] sm:$0xff] (!%p1199_p1), %v1966_v0  ;;  %333 = vst [vmem:[#allocation2 + $0x38] sm:$0xff] (!%p1199_p1), %v1966_v0 }
  0x9a   : > { %334 = vst [vmem:[#allocation2 + $0x40] sm:$0xff] (!%p1199_p1), %v1966_v0  ;;  %335 = vst [vmem:[#allocation2 + $0x48] sm:$0xff] (!%p1199_p1), %v1966_v0 }
  0x9b   : > { %336 = vst [vmem:[#allocation2 + $0x50] sm:$0xff] (!%p1199_p1), %v1966_v0  ;;  %337 = vst [vmem:[#allocation2 + $0x58] sm:$0xff] (!%p1199_p1), %v1966_v0 }
  0x9c   : > { %338 = vst [vmem:[#allocation2 + $0x60] sm:$0xff] (!%p1199_p1), %v1966_v0  ;;  %339 = vst [vmem:[#allocation2 + $0x68] sm:$0xff] (!%p1199_p1), %v1966_v0 }
  0x9d   : > { %340 = vst [vmem:[#allocation2 + $0x70] sm:$0xff] %v1966_v0  ;;  %341 = vst [vmem:[#allocation2 + $0x78] sm:$0xff] %v1966_v0 }
  0x9e PF: > { %v358_v1 = vld [vmem:[%s2227_s28] sm:$0xff]  ;;  %v359_v2 = vld [vmem:[%s2227_s28 + $0x8] sm:$0xff]  ;;  %v360_v3 = vld [vmem:[%s2227_s28 + $0x10] sm:$0xff]  ;;  %p1216_p4 = scmp.ne.s32.totalorder %s1949_s18, 1 }
  0x9f   : > { %v1486_v4 = vpack.c.bf16 %v359_v2, %v358_v1  ;;  %v361_v5 = vld [vmem:[%s2227_s28 + $0x18] sm:$0xff]  ;;  %v362_v7 = vld [vmem:[%s2227_s28 + $0x20] sm:$0xff]  ;;  %v363_v8 = vld [vmem:[%s2227_s28 + $0x28] sm:$0xff] }
  0xa0   : > { %v1490_v6 = vpack.c.bf16 %v361_v5, %v360_v3  ;;  %v519_v9 = vld [vmem:[%s2233_s24] sm:$0xff]  ;;  %v1494_v10 = vpack.c.bf16 %v363_v8, %v362_v7  ;;  %v364_v11 = vld [vmem:[%s2227_s28 + $0x30] sm:$0xff]  ;;  %v365_v12 = vld [vmem:[%s2227_s28 + $0x38] sm:$0xff] }
  0xa1   : > { %1487 = vmatprep.subr.bf16.mxu0 %v1486_v4  ;;  %v520_v13 = vld [vmem:[%s2233_s24 + $0x8] sm:$0xff]  ;;  %v342_v15 = vld [vmem:[#allocation3] sm:$0xff]  ;;  %v521_v16 = vld [vmem:[%s2233_s24 + $0x10] sm:$0xff]  ;;  %v1498_v21 = vpack.c.bf16 %v365_v12, %v364_v11 }
  0xa2   : > { %1489 = vmatpush3.bf16.msra.mxu0 %v1486_v4  ;;  %v1518_v14 = vpack.c.bf16 %v520_v13, %v519_v9  ;;  %v522_v17 = vld [vmem:[%s2233_s24 + $0x18] sm:$0xff]  ;;  %1350 = vmatprep.mubr.f32.mxu0 %v342_v15  ;;  %v523_v19 = vld [vmem:[%s2233_s24 + $0x20] sm:$0xff]  ;;  %v524_v20 = vld [vmem:[%s2233_s24 + $0x28] sm:$0xff] }
  0xa3   : > { %1491 = vmatprep.subr.bf16.mxu0 %v1490_v6  ;;  %v1522_v18 = vpack.c.bf16 %v522_v17, %v521_v16  ;;  %1406 = vmatprep.mubr.f32.mxu1 %v342_v15  ;;  %v366_v22 = vld [vmem:[%s2227_s28 + $0x40] sm:$0xff]  ;;  %v367_v23 = vld [vmem:[%s2227_s28 + $0x48] sm:$0xff]  ;;  %v1526_v24 = vpack.c.bf16 %v524_v20, %v523_v19  ;;  %v525_v25 = vld [vmem:[%s2233_s24 + $0x30] sm:$0xff] }
  0xa4   : > { %1519 = vmatprep.subr.bf16.mxu1 %v1518_v14  ;;  %v526_v26 = vld [vmem:[%s2233_s24 + $0x38] sm:$0xff]  ;;  %v1502_v27 = vpack.c.bf16 %v367_v23, %v366_v22  ;;  %v368_v28 = vld [vmem:[%s2227_s28 + $0x50] sm:$0xff]  ;;  %v527_v31 = vld [vmem:[%s2233_s24 + $0x40] sm:$0xff] }
  0xa5   : > { %1521 = vmatpush3.bf16.msra.mxu1 %v1518_v14  ;;  %v369_v29 = vld [vmem:[%s2227_s28 + $0x58] sm:$0xff]  ;;  %v1530_v30 = vpack.c.bf16 %v526_v26, %v525_v25  ;;  %v528_v32 = vld [vmem:[%s2233_s24 + $0x48] sm:$0xff]  ;;  %v370_v34 = vld [vmem:[%s2227_s28 + $0x60] sm:$0xff] }
  0xa6   : > { %1493 = vmatpush3.bf16.msra.mxu0 %v1490_v6  ;;  %1523 = vmatprep.subr.bf16.mxu1 %v1522_v18  ;;  %v1506_v33 = vpack.c.bf16 %v369_v29, %v368_v28  ;;  %v371_v35 = vld [vmem:[%s2227_s28 + $0x68] sm:$0xff]  ;;  %v1534_v36 = vpack.c.bf16 %v528_v32, %v527_v31  ;;  %v529_v37 = vld [vmem:[%s2233_s24 + $0x50] sm:$0xff]  ;;  %v530_v38 = vld [vmem:[%s2233_s24 + $0x58] sm:$0xff] }
  0xa7   : > { %1495 = vmatprep.subr.bf16.mxu0 %v1494_v10  ;;  %v1510_v39 = vpack.c.bf16 %v371_v35, %v370_v34  ;;  %v372_v40 = vld [vmem:[%s2227_s28 + $0x70] sm:$0xff]  ;;  %v373_v41 = vld [vmem:[%s2227_s28 + $0x78] sm:$0xff]  ;;  %v1538_v42 = vpack.c.bf16 %v530_v38, %v529_v37  ;;  %v531_v43 = vld [vmem:[%s2233_s24 + $0x60] sm:$0xff] }
  0xa8   : > { %v532_v44 = vld [vmem:[%s2233_s24 + $0x68] sm:$0xff]  ;;  %v1514_v45 = vpack.c.bf16 %v373_v41, %v372_v40  ;;  %v533_v47 = vld [vmem:[%s2233_s24 + $0x70] sm:$0xff]  ;;  %v534_v48 = vld [vmem:[%s2233_s24 + $0x78] sm:$0xff] }
  0xa9   : > { %1525 = vmatpush3.bf16.msra.mxu1 %v1522_v18  ;;  %v1542_v46 = vpack.c.bf16 %v532_v44, %v531_v43  ;;  %v1546_v49 = vpack.c.bf16 %v534_v48, %v533_v47  ;;  %v343_v50 = vld [vmem:[#allocation3 + $0x8] sm:$0xff]  ;;  %v344_v51 = vld [vmem:[#allocation3 + $0x10] sm:$0xff]  ;;  %v345_v52 = vld [vmem:[#allocation3 + $0x18] sm:$0xff] }
  0xaa   : > { %1497 = vmatpush3.bf16.msra.mxu0 %v1494_v10  ;;  %1527 = vmatprep.subr.bf16.mxu1 %v1526_v24  ;;  %v346_v53 = vld [vmem:[#allocation3 + $0x20] sm:$0xff]  ;;  %v347_v54 = vld [vmem:[#allocation3 + $0x28] sm:$0xff]  ;;  %v348_v55 = vld [vmem:[#allocation3 + $0x30] sm:$0xff] }
  0xab   : > { %1499 = vmatprep.subr.bf16.mxu0 %v1498_v21  ;;  %v349_v56 = vld [vmem:[#allocation3 + $0x38] sm:$0xff]  ;;  %v350_v57 = vld [vmem:[#allocation3 + $0x40] sm:$0xff]  ;;  %v351_v58 = vld [vmem:[#allocation3 + $0x48] sm:$0xff] }
  0xac   : > { %v352_v59 = vld [vmem:[#allocation3 + $0x50] sm:$0xff]  ;;  %v353_v60 = vld [vmem:[#allocation3 + $0x58] sm:$0xff]  ;;  %v354_v61 = vld [vmem:[#allocation3 + $0x60] sm:$0xff] }
  0xad   : > { %1529 = vmatpush3.bf16.msra.mxu1 %v1526_v24  ;;  %v355_v62 = vld [vmem:[#allocation3 + $0x68] sm:$0xff]  ;;  %v356_v63 = vld [vmem:[#allocation3 + $0x70] sm:$0xff]  ;;  %v357_v0 = vld [vmem:[#allocation3 + $0x78] sm:$0xff] }
  0xae   : > { %1501 = vmatpush3.bf16.msra.mxu0 %v1498_v21  ;;  %1531 = vmatprep.subr.bf16.mxu1 %v1530_v30  ;;  %v808_v1 = vld [vmem:[%s2235_s26] sm:$0xff]  ;;  %v809_v2 = vld [vmem:[%s2235_s26 + $0x8] sm:$0xff]  ;;  %v810_v4 = vld [vmem:[%s2235_s26 + $0x10] sm:$0xff] }
  0xaf   : > { %1503 = vmatprep.subr.bf16.mxu0 %v1502_v27  ;;  %v1550_v3 = vpack.c.bf16 %v809_v2, %v808_v1  ;;  %v811_v5 = vld [vmem:[%s2235_s26 + $0x18] sm:$0xff]  ;;  %v812_v7 = vld [vmem:[%s2235_s26 + $0x20] sm:$0xff]  ;;  %v813_v8 = vld [vmem:[%s2235_s26 + $0x28] sm:$0xff] }
  0xb0   : > { %v1554_v6 = vpack.c.bf16 %v811_v5, %v810_v4  ;;  %v1558_v9 = vpack.c.bf16 %v813_v8, %v812_v7  ;;  %v814_v10 = vld [vmem:[%s2235_s26 + $0x30] sm:$0xff]  ;;  %v815_v11 = vld [vmem:[%s2235_s26 + $0x38] sm:$0xff]  ;;  %v816_v13 = vld [vmem:[%s2235_s26 + $0x40] sm:$0xff] }
  0xb1   : > { %1533 = vmatpush3.bf16.msra.mxu1 %v1530_v30  ;;  %v1562_v12 = vpack.c.bf16 %v815_v11, %v814_v10  ;;  %v817_v14 = vld [vmem:[%s2235_s26 + $0x48] sm:$0xff]  ;;  %v818_v16 = vld [vmem:[%s2235_s26 + $0x50] sm:$0xff]  ;;  %v819_v17 = vld [vmem:[%s2235_s26 + $0x58] sm:$0xff] }
  0xb2   : > { %1505 = vmatpush3.bf16.msra.mxu0 %v1502_v27  ;;  %1535 = vmatprep.subr.bf16.mxu1 %v1534_v36  ;;  %v1566_v15 = vpack.c.bf16 %v817_v14, %v816_v13  ;;  %v1570_v18 = vpack.c.bf16 %v819_v17, %v818_v16  ;;  %v820_v19 = vld [vmem:[%s2235_s26 + $0x60] sm:$0xff]  ;;  %v821_v20 = vld [vmem:[%s2235_s26 + $0x68] sm:$0xff]  ;;  %v822_v22 = vld [vmem:[%s2235_s26 + $0x70] sm:$0xff] }
  0xb3   : > { %1507 = vmatprep.subr.bf16.mxu0 %v1506_v33  ;;  %v1574_v21 = vpack.c.bf16 %v821_v20, %v820_v19  ;;  %v823_v23 = vld [vmem:[%s2235_s26 + $0x78] sm:$0xff] }
  0xb4   : > { %v1578_v24 = vpack.c.bf16 %v823_v23, %v822_v22 }
  0xb5   : > { %1537 = vmatpush3.bf16.msra.mxu1 %v1534_v36 }
  0xb6   : > { %1509 = vmatpush3.bf16.msra.mxu0 %v1506_v33  ;;  %1539 = vmatprep.subr.bf16.mxu1 %v1538_v42 }
  0xb7   : > { %1511 = vmatprep.subr.bf16.mxu0 %v1510_v39 }
  0xb9   : > { %1541 = vmatpush3.bf16.msra.mxu1 %v1538_v42 }
  0xba   : > { %1513 = vmatpush3.bf16.msra.mxu0 %v1510_v39  ;;  %1543 = vmatprep.subr.bf16.mxu1 %v1542_v46 }
  0xbb   : > { %1515 = vmatprep.subr.bf16.mxu0 %v1514_v45 }
  0xbd   : > { %1545 = vmatpush3.bf16.msra.mxu1 %v1542_v46 }
  0xbe   : > { %1517 = vmatpush3.bf16.msra.mxu0 %v1514_v45  ;;  %1547 = vmatprep.subr.bf16.mxu1 %v1546_v49 }
  0xbf   : > { %1551 = vmatprep.subr.bf16.mxu0 %v1550_v3 }
  0xc1   : > { %1351 = vmatmul.mubr.f32.vlgmr.msra.gmra.mrb[0].mxu0 %v343_v50  ;;  %1549 = vmatpush3.bf16.msra.mxu1 %v1546_v49 }
  0xc2   : > { %1353 = vmatprep.mubr.f32.mxu0 %v344_v51  ;;  %1582 = vmatprep.subr.bf16.mxu1 %v1550_v3 }
  0xc3   : > { %1553 = vmatpush3.bf16.msra.mxu0 %v1550_v3 }
  0xc4   : > { %1407 = vmatmul.mubr.f32.vlgmr.msra.gmra.mrb[0].mxu1 %v343_v50  ;;  %1555 = vmatprep.subr.bf16.mxu0 %v1554_v6 }
  0xc5   : > { %1354 = vmatmul.mubr.f32.gmra.mrb[2].mxu0 %v345_v52  ;;  %1409 = vmatprep.mubr.f32.mxu1 %v344_v51 }
  0xc6   : > { %1356 = vmatprep.mubr.f32.mxu0 %v346_v53  ;;  %1590 = vmatpush3.bf16.msra.mxu1 %v1550_v3 }
  0xc7   : > { %1583 = vmatprep.subr.bf16.mxu1 %v1554_v6  ;;  %1557 = vmatpush3.bf16.msra.mxu0 %v1554_v6 }
  0xc8   : > { %1410 = vmatmul.mubr.f32.gmra.mrb[2].mxu1 %v345_v52  ;;  %1559 = vmatprep.subr.bf16.mxu0 %v1558_v9 }
  0xc9   : > { %1357 = vmatmul.mubr.f32.gmra.mrb[4].mxu0 %v347_v54  ;;  %1412 = vmatprep.mubr.f32.mxu1 %v346_v53 }
  0xca   : > { %1359 = vmatprep.mubr.f32.mxu0 %v348_v55  ;;  %1591 = vmatpush3.bf16.msra.mxu1 %v1554_v6 }
  0xcb   : > { %1584 = vmatprep.subr.bf16.mxu1 %v1558_v9  ;;  %1561 = vmatpush3.bf16.msra.mxu0 %v1558_v9 }
  0xcc   : > { %1413 = vmatmul.mubr.f32.gmra.mrb[4].mxu1 %v347_v54  ;;  %1563 = vmatprep.subr.bf16.mxu0 %v1562_v12 }
  0xcd   : > { %1360 = vmatmul.mubr.f32.gmra.mrb[6].mxu0 %v349_v56  ;;  %1415 = vmatprep.mubr.f32.mxu1 %v348_v55 }
  0xce   : > { %1362 = vmatprep.mubr.f32.mxu0 %v350_v57  ;;  %1592 = vmatpush3.bf16.msra.mxu1 %v1558_v9 }
  0xcf   : > { %1585 = vmatprep.subr.bf16.mxu1 %v1562_v12  ;;  %1565 = vmatpush3.bf16.msra.mxu0 %v1562_v12 }
  0xd0   : > { %1416 = vmatmul.mubr.f32.gmra.mrb[6].mxu1 %v349_v56  ;;  %1567 = vmatprep.subr.bf16.mxu0 %v1566_v15 }
  0xd1   : > { %1363 = vmatmul.mubr.f32.gmra.mrb[8].mxu0 %v351_v58  ;;  %1418 = vmatprep.mubr.f32.mxu1 %v350_v57 }
  0xd2   : > { %1365 = vmatprep.mubr.f32.mxu0 %v352_v59  ;;  %1593 = vmatpush3.bf16.msra.mxu1 %v1562_v12 }
  0xd3   : > { %1586 = vmatprep.subr.bf16.mxu1 %v1566_v15  ;;  %1569 = vmatpush3.bf16.msra.mxu0 %v1566_v15 }
  0xd4   : > { %1419 = vmatmul.mubr.f32.gmra.mrb[8].mxu1 %v351_v58  ;;  %1571 = vmatprep.subr.bf16.mxu0 %v1570_v18 }
  0xd5   : > { %1366 = vmatmul.mubr.f32.gmra.mrb[10].mxu0 %v353_v60  ;;  %1421 = vmatprep.mubr.f32.mxu1 %v352_v59 }
  0xd6   : > { %1368 = vmatprep.mubr.f32.mxu0 %v354_v61  ;;  %1594 = vmatpush3.bf16.msra.mxu1 %v1566_v15 }
  0xd7   : > { %1587 = vmatprep.subr.bf16.mxu1 %v1570_v18  ;;  %1573 = vmatpush3.bf16.msra.mxu0 %v1570_v18 }
  0xd8   : > { %1422 = vmatmul.mubr.f32.gmra.mrb[10].mxu1 %v353_v60  ;;  %1575 = vmatprep.subr.bf16.mxu0 %v1574_v21 }
  0xd9   : > { %1369 = vmatmul.mubr.f32.gmra.mrb[12].mxu0 %v355_v62  ;;  %1424 = vmatprep.mubr.f32.mxu1 %v354_v61 }
  0xda   : > { %1371 = vmatprep.mubr.f32.mxu0 %v356_v63  ;;  %1595 = vmatpush3.bf16.msra.mxu1 %v1570_v18 }
  0xdb   : > { %1588 = vmatprep.subr.bf16.mxu1 %v1574_v21  ;;  %1577 = vmatpush3.bf16.msra.mxu0 %v1574_v21 }
  0xdc   : > { %1425 = vmatmul.mubr.f32.gmra.mrb[12].mxu1 %v355_v62  ;;  %1579 = vmatprep.subr.bf16.mxu0 %v1578_v24 }
  0xdd   : > { %1372 = vmatmul.mubr.f32.gmra.mrb[14].mxu0 %v357_v0  ;;  %1427 = vmatprep.mubr.f32.mxu1 %v356_v63 }
  0xde   : > { %1596 = vmatpush3.bf16.msra.mxu1 %v1574_v21 }
  0xdf   : > { %1589 = vmatprep.subr.bf16.mxu1 %v1578_v24  ;;  %1581 = vmatpush3.bf16.msra.mxu0 %v1578_v24 }
  0xe0   : > { %1428 = vmatmul.mubr.f32.gmra.mrb[14].mxu1 %v357_v0 }
  0xe2   : > { %1597 = vmatpush3.bf16.msra.mxu1 %v1578_v24 }
 0x194   : > { %v2290_v25 = vpop.f32.mrb[0].mxu0 }
 0x195   : > { %v1201_v26 = vmul.f32 -1.442695, %v2290_v25  ;;  %v2293_v27 = vpop.f32.mrb[1].mxu0 }
 0x196   : > { %v1200_v28 = vmul.f32 -1.442695, %v2293_v27 }
 0x197   : > { %1687 = vpow2.f32 %v1201_v26  ;;  %v2301_v32 = vpop.f32.mrb[0].mxu1 }
 0x198   : > { %1689 = vpow2.f32 %v1200_v28  ;;  %v2296_v29 = vpop.f32.mrb[2].mxu0  ;;  %v2304_v34 = vpop.f32.mrb[1].mxu1 }
 0x199   : > { %v1203_v30 = vmul.f32 -1.442695, %v2296_v29  ;;  %v2299_v31 = vpop.f32.mrb[3].mxu0 }
 0x19a   : > { %v1202_v33 = vmul.f32 -1.442695, %v2299_v31 }
 0x19b   : > { %1691 = vpow2.f32 %v1203_v30  ;;  %v2311_v38 = vpop.f32.mrb[2].mxu1 }
 0x19c   : > { %1693 = vpow2.f32 %v1202_v33  ;;  %v2306_v35 = vpop.f32.mrb[4].mxu0  ;;  %v2314_v40 = vpop.f32.mrb[3].mxu1 }
 0x19d   : > { %v1205_v36 = vmul.f32 -1.442695, %v2306_v35  ;;  %v2309_v37 = vpop.f32.mrb[5].mxu0 }
 0x19e   : > { %v1204_v39 = vmul.f32 -1.442695, %v2309_v37 }
 0x19f   : > { %1695 = vpow2.f32 %v1205_v36  ;;  %v2321_v45 = vpop.f32.mrb[4].mxu1 }
 0x1a0   : > { %1697 = vpow2.f32 %v1204_v39  ;;  %v2316_v41 = vpop.f32.mrb[6].mxu0  ;;  %v2324_v49 = vpop.f32.mrb[5].mxu1 }
 0x1a1   : > { %v1688_v42 = vpop.eup %1687  ;;  %v1207_v43 = vmul.f32 -1.442695, %v2316_v41  ;;  %v2319_v44 = vpop.f32.mrb[7].mxu0 }
 0x1a2   : > { %v1690_v46 = vpop.eup %1689  ;;  %v729_v47 = vadd.f32 1.0, %v1688_v42  ;;  %v1206_v48 = vmul.f32 -1.442695, %v2319_v44 }
 0x1a3   : > { %v728_v50 = vadd.f32 1.0, %v1690_v46  ;;  %1699 = vpow2.f32 %v1207_v43  ;;  %v2331_v55 = vpop.f32.mrb[6].mxu1 }
 0x1a4   : > { %1701 = vrcp.f32 %v729_v47  ;;  %v2326_v51 = vpop.f32.mrb[8].mxu0  ;;  %v2334_v59 = vpop.f32.mrb[7].mxu1 }
 0x1a5   : > { %v1692_v52 = vpop.eup %1691  ;;  %1703 = vrcp.f32 %v728_v50  ;;  %v1209_v53 = vmul.f32 -1.442695, %v2326_v51  ;;  %v2329_v54 = vpop.f32.mrb[9].mxu0 }
 0x1a6   : > { %v1694_v56 = vpop.eup %1693  ;;  %v731_v57 = vadd.f32 1.0, %v1692_v52  ;;  %1705 = vpow2.f32 %v1206_v48  ;;  %v1208_v58 = vmul.f32 -1.442695, %v2329_v54 }
 0x1a7   : > { %v730_v60 = vadd.f32 1.0, %v1694_v56  ;;  %1707 = vpow2.f32 %v1209_v53  ;;  %v2341_v1 = vpop.f32.mrb[8].mxu1 }
 0x1a8   : > { %1709 = vrcp.f32 %v731_v57  ;;  %v2336_v61 = vpop.f32.mrb[10].mxu0  ;;  %v2344_v5 = vpop.f32.mrb[9].mxu1 }
 0x1a9   : > { %v1696_v62 = vpop.eup %1695  ;;  %1711 = vrcp.f32 %v730_v60  ;;  %v1211_v63 = vmul.f32 -1.442695, %v2336_v61  ;;  %v2339_v0 = vpop.f32.mrb[11].mxu0 }
 0x1aa   : > { %v1698_v2 = vpop.eup %1697  ;;  %v733_v3 = vadd.f32 1.0, %v1696_v62  ;;  %1713 = vpow2.f32 %v1208_v58  ;;  %v1210_v4 = vmul.f32 -1.442695, %v2339_v0 }
 0x1ab   : > { %v732_v6 = vadd.f32 1.0, %v1698_v2  ;;  %1715 = vpow2.f32 %v1211_v63  ;;  %v2351_v11 = vpop.f32.mrb[10].mxu1 }
 0x1ac   : > { %1717 = vrcp.f32 %v733_v3  ;;  %v2346_v7 = vpop.f32.mrb[12].mxu0  ;;  %v2354_v15 = vpop.f32.mrb[11].mxu1 }
 0x1ad   : > { %v1700_v8 = vpop.eup %1699  ;;  %1719 = vrcp.f32 %v732_v6  ;;  %v1213_v9 = vmul.f32 -1.442695, %v2346_v7  ;;  %v2349_v10 = vpop.f32.mrb[13].mxu0 }
 0x1ae   : > { %v1702_v12 = vpop.eup %1701  ;;  %v735_v13 = vadd.f32 1.0, %v1700_v8  ;;  %1721 = vpow2.f32 %v1210_v4  ;;  %v1212_v14 = vmul.f32 -1.442695, %v2349_v10 }
 0x1af   : > { %v1704_v16 = vpop.eup %1703  ;;  %v777_v17 = vmul.f32 %v1702_v12, %v2290_v25  ;;  %1723 = vpow2.f32 %v1213_v9  ;;  %v2364_v28 = vpop.f32.mrb[12].mxu1 }
 0x1b0   : > { %v1706_v18 = vpop.eup %1705  ;;  %v776_v19 = vmul.f32 %v1704_v16, %v2293_v27  ;;  %1725 = vrcp.f32 %v735_v13  ;;  %v2358_v20 = vpop.f32.mrb[14].mxu0 }
 0x1b1   : > { %v1708_v21 = vpop.eup %1707  ;;  %v734_v22 = vadd.f32 1.0, %v1706_v18  ;;  %1727 = vpow2.f32 %v1212_v14  ;;  %v793_v23 = vmul.f32 %v2301_v32, %v777_v17  ;;  %v1215_v24 = vmul.f32 -1.442695, %v2358_v20  ;;  %v2362_v26 = vpop.f32.mrb[15].mxu0 }
 0x1b2   : > { %v1710_v30 = vpop.eup %1709  ;;  %v737_v25 = vadd.f32 1.0, %v1708_v21  ;;  %v792_v33 = vmul.f32 %v776_v19, %v2304_v34  ;;  %v1214_v27 = vmul.f32 -1.442695, %v2362_v26  ;;  %v2368_v36 = vpop.f32.mrb[13].mxu1 }
 0x1b3   : > { %v1712_v39 = vpop.eup %1711  ;;  %v779_v42 = vmul.f32 %v1710_v30, %v2296_v29  ;;  %1729 = vrcp.f32 %v734_v22  ;;  %v2373_v34 = vpop.f32.mrb[14].mxu1 }
 0x1b4   : > { %v1714_v43 = vpop.eup %1713  ;;  %v778_v32 = vmul.f32 %v1712_v39, %v2299_v31  ;;  %1731 = vrcp.f32 %v737_v25  ;;  %1462 = vmatprep.mubr.f32.mxu0 %v792_v33  ;;  %v2376_v29 = vpop.f32.mrb[15].mxu1 }
 0x1b5   : > { %v1716_v46 = vpop.eup %1715  ;;  %v736_v47 = vadd.f32 1.0, %v1714_v43  ;;  %1733 = vpow2.f32 %v1215_v24  ;;  %v795_v48 = vmul.f32 %v2311_v38, %v779_v42  ;;  %1463 = vmatmul.mubr.f32.vlgmr.msra.gmra.mrb[16].mxu0 %v793_v23  ;;  %v827_v42 = vld [vmem:[#allocation2 + $0x18] sm:$0xff]  ;;  %v826_v43 = vld [vmem:[#allocation2 + $0x10] sm:$0xff] }
 0x1b6   : > { %v1718_v50 = vpop.eup %1717  ;;  %v739_v52 = vadd.f32 1.0, %v1716_v46  ;;  %1735 = vpow2.f32 %v1214_v27  ;;  %v794_v53 = vmul.f32 %v778_v32, %v2314_v40 }
 0x1b7   : > { %v1720_v56 = vpop.eup %1719  ;;  %v781_v31 = vmul.f32 %v1718_v50, %v2306_v35  ;;  %1737 = vrcp.f32 %v736_v47  ;;  %v829_v47 = vld [vmem:[#allocation2 + $0x28] sm:$0xff] }
 0x1b8   : > { %v1722_v57 = vpop.eup %1721  ;;  %v780_v58 = vmul.f32 %v1720_v56, %v2309_v37  ;;  %1739 = vrcp.f32 %v739_v52  ;;  %1465 = vmatprep.mubr.f32.mxu0 %v794_v53  ;;  %v830_v56 = vld [vmem:[#allocation2 + $0x30] sm:$0xff] }
 0x1b9   : > { %v1724_v38 = vpop.eup %1723  ;;  %v738_v60 = vadd.f32 1.0, %v1722_v57  ;;  %v797_v62 = vmul.f32 %v2321_v45, %v781_v31  ;;  %1466 = vmatmul.mubr.f32.gmra.mrb[18].mxu0 %v795_v48  ;;  %v828_v48 = vld [vmem:[#allocation2 + $0x20] sm:$0xff] }
 0x1ba   : > { %v1726_v63 = vpop.eup %1725  ;;  %v741_v2 = vadd.f32 1.0, %v1724_v38  ;;  %v796_v40 = vmul.f32 %v780_v58, %v2324_v49 }
 0x1bb   : > { %v1728_v3 = vpop.eup %1727  ;;  %v783_v4 = vmul.f32 %v1726_v63, %v2316_v41  ;;  %1741 = vrcp.f32 %v738_v60  ;;  %v833_v60 = vld [vmem:[#allocation2 + $0x48] sm:$0xff] }
 0x1bc   : > { %1743 = vrcp.f32 %v741_v2  ;;  %v740_v35 = vadd.f32 1.0, %v1728_v3  ;;  %1468 = vmatprep.mubr.f32.mxu0 %v796_v40 }
 0x1bd   : > { %v1730_v6 = vpop.eup %1729  ;;  %v799_v37 = vmul.f32 %v2331_v55, %v783_v4  ;;  %1469 = vmatmul.mubr.f32.gmra.mrb[20].mxu0 %v797_v62  ;;  %v832_v62 = vld [vmem:[#allocation2 + $0x40] sm:$0xff]  ;;  %v835_v4 = vld [vmem:[#allocation2 + $0x58] sm:$0xff] }
 0x1be   : > { %v1732_v8 = vpop.eup %1731  ;;  %v782_v9 = vmul.f32 %v1730_v6, %v2319_v44  ;;  %1745 = vrcp.f32 %v740_v35  ;;  %v834_v35 = vld [vmem:[#allocation2 + $0x50] sm:$0xff] }
 0x1bf   : > { %v1734_v45 = vpop.eup %1733  ;;  %v785_v12 = vmul.f32 %v1732_v8, %v2326_v51 }
 0x1c0   : > { %v1736_v13 = vpop.eup %1735  ;;  %v743_v49 = vadd.f32 1.0, %v1734_v45  ;;  %v798_v14 = vmul.f32 %v782_v9, %v2334_v59  ;;  %v837_v45 = vld [vmem:[#allocation2 + $0x68] sm:$0xff] }
 0x1c1   : > { %v1738_v41 = vpop.eup %1737  ;;  %v742_v16 = vadd.f32 1.0, %v1736_v13  ;;  %v801_v17 = vmul.f32 %v2341_v1, %v785_v12  ;;  %v836_v12 = vld [vmem:[#allocation2 + $0x60] sm:$0xff] }
 0x1c2   : > { %v1740_v18 = vpop.eup %1739  ;;  %v784_v19 = vmul.f32 %v1738_v41, %v2329_v54  ;;  %1747 = vrcp.f32 %v743_v49  ;;  %1471 = vmatprep.mubr.f32.mxu0 %v798_v14 }
 0x1c3   : > { %v787_v55 = vmul.f32 %v1740_v18, %v2336_v61  ;;  %1749 = vrcp.f32 %v742_v16  ;;  %1472 = vmatmul.mubr.f32.gmra.mrb[22].mxu0 %v799_v37  ;;  %v839_v16 = vld [vmem:[#allocation2 + $0x78] sm:$0xff] }
 0x1c4   : > { %v800_v44 = vmul.f32 %v784_v19, %v2344_v5 }
 0x1c5   : > { %v1742_v51 = vpop.eup %1741  ;;  %v803_v21 = vmul.f32 %v2351_v11, %v787_v55 }
 0x1c6   : > { %v1744_v22 = vpop.eup %1743  ;;  %v786_v59 = vmul.f32 %v1742_v51, %v2339_v0  ;;  %1474 = vmatprep.mubr.f32.mxu1 %v800_v44 }
 0x1c7   : > { %v789_v1 = vmul.f32 %v1744_v22, %v2346_v7  ;;  %1475 = vmatmul.mubr.f32.vlgmr.msra.gmra.mrb[16].mxu1 %v801_v17  ;;  %v838_v17 = vld [vmem:[#allocation2 + $0x70] sm:$0xff] }
 0x1c8   : > { %v1746_v23 = vpop.eup %1745  ;;  %v802_v54 = vmul.f32 %v786_v59, %v2354_v15 }
 0x1c9   : > { %v788_v24 = vmul.f32 %v1746_v23, %v2349_v10  ;;  %v805_v61 = vmul.f32 %v2364_v28, %v789_v1  ;;  %v825_v10 = vld [vmem:[#allocation2 + $0x8] sm:$0xff]  ;;  %v824_v28 = vld [vmem:[#allocation2] sm:$0xff] }
 0x1ca   : > { %1477 = vmatprep.mubr.f32.mxu1 %v802_v54 }
 0x1cb   : > { %v804_v5 = vmul.f32 %v788_v24, %v2368_v36  ;;  %1478 = vmatmul.mubr.f32.gmra.mrb[18].mxu1 %v803_v21 }
 0x1cc   : > { %v1748_v30 = vpop.eup %1747 }
 0x1cd   : > { %v1750_v11 = vpop.eup %1749  ;;  %v791_v25 = vmul.f32 %v1748_v30, %v2358_v20  ;;  %1480 = vmatprep.mubr.f32.mxu1 %v804_v5 }
 0x1ce   : > { %v790_v0 = vmul.f32 %v1750_v11, %v2362_v26 }
 0x1cf   : > { %v807_v7 = vmul.f32 %v2373_v34, %v791_v25  ;;  %1481 = vmatmul.mubr.f32.gmra.mrb[20].mxu1 %v805_v61 }
 0x1d0   : > { %v806_v15 = vmul.f32 %v790_v0, %v2376_v29  ;;  %v831_v29 = vld [vmem:[#allocation2 + $0x38] sm:$0xff] }
 0x1d2   : > { %1483 = vmatprep.mubr.f32.mxu1 %v806_v15 }
 0x1d3   : > { %1484 = vmatmul.mubr.f32.gmra.mrb[22].mxu1 %v807_v7 }
 0x288   : > { %v1464_v33 = vpop.f32.mrb[16].mxu0 }
 0x289   : > { %v986_v27 = vadd.f32 %v1464_v33, %v825_v10  ;;  %v906_v36 = vpop.f32.mrb[17].mxu0 }
 0x28a   : > { %v985_v39 = vadd.f32 %v906_v36, %v824_v28 }
 0x28b   : > { %1002 = vst [vmem:[#allocation2 + $0x8] sm:$0xff] %v986_v27 }
 0x28c   : > { %1001 = vst [vmem:[#allocation2] sm:$0xff] %v985_v39  ;;  %v1467_v20 = vpop.f32.mrb[18].mxu0 }
 0x28d   : > { %v988_v32 = vadd.f32 %v1467_v20, %v827_v42  ;;  %v916_v26 = vpop.f32.mrb[19].mxu0 }
 0x28e   : > { %v987_v46 = vadd.f32 %v916_v26, %v826_v43 }
 0x28f   : > { %1004 = vst [vmem:[#allocation2 + $0x18] sm:$0xff] %v988_v32 }
 0x290   : > { %1003 = vst [vmem:[#allocation2 + $0x10] sm:$0xff] %v987_v46  ;;  %v1470_v34 = vpop.f32.mrb[20].mxu0 }
 0x291   : > { %v990_v50 = vadd.f32 %v1470_v34, %v829_v47  ;;  %v926_v52 = vpop.f32.mrb[21].mxu0 }
 0x292   : > { %v989_v53 = vadd.f32 %v926_v52, %v828_v48  ;;  %v1022_v21 = vld [vmem:[#allocation2 + $0x8] sm:$0xff] (!%p1216_p4) }
 0x293   : > { %1006 = vst [vmem:[#allocation2 + $0x28] sm:$0xff] %v990_v50  ;;  %v1021_v51 = vld [vmem:[#allocation2] sm:$0xff] (!%p1216_p4)  ;;  %1038 = vst [vmem:[#allocation11 + $0x8] sm:$0xff] (!%p1216_p4), %v1022_v21 }
 0x294   : > { %1005 = vst [vmem:[#allocation2 + $0x20] sm:$0xff] %v989_v53  ;;  %1037 = vst [vmem:[#allocation11] sm:$0xff] (!%p1216_p4), %v1021_v51 }
 0x296   : > { %v1473_v31 = vpop.f32.mrb[22].mxu0  ;;  %v1024_v59 = vld [vmem:[#allocation2 + $0x18] sm:$0xff] (!%p1216_p4) }
 0x297   : > { %v992_v57 = vadd.f32 %v1473_v31, %v831_v29  ;;  %v936_v58 = vpop.f32.mrb[23].mxu0  ;;  %v1023_v22 = vld [vmem:[#allocation2 + $0x10] sm:$0xff] (!%p1216_p4)  ;;  %1040 = vst [vmem:[#allocation11 + $0x18] sm:$0xff] (!%p1216_p4), %v1024_v59 }
 0x298   : > { %v991_v38 = vadd.f32 %v936_v58, %v830_v56  ;;  %1039 = vst [vmem:[#allocation11 + $0x10] sm:$0xff] (!%p1216_p4), %v1023_v22 }
 0x299   : > { %1008 = vst [vmem:[#allocation2 + $0x38] sm:$0xff] %v992_v57 }
 0x29a   : > { %1007 = vst [vmem:[#allocation2 + $0x30] sm:$0xff] %v991_v38  ;;  %v1476_v63 = vpop.f32.mrb[16].mxu1  ;;  %v1026_v23 = vld [vmem:[#allocation2 + $0x28] sm:$0xff] (!%p1216_p4) }
 0x29b   : > { %v994_v2 = vadd.f32 %v1476_v63, %v833_v60  ;;  %v946_v40 = vpop.f32.mrb[17].mxu1  ;;  %v1025_v1 = vld [vmem:[#allocation2 + $0x20] sm:$0xff] (!%p1216_p4)  ;;  %1042 = vst [vmem:[#allocation11 + $0x28] sm:$0xff] (!%p1216_p4), %v1026_v23 }
 0x29c   : > { %v993_v3 = vadd.f32 %v946_v40, %v832_v62  ;;  %1041 = vst [vmem:[#allocation11 + $0x20] sm:$0xff] (!%p1216_p4), %v1025_v1 }
 0x29d   : > { %1010 = vst [vmem:[#allocation2 + $0x48] sm:$0xff] %v994_v2 }
 0x29e   : > { %1009 = vst [vmem:[#allocation2 + $0x40] sm:$0xff] %v993_v3  ;;  %v1479_v6 = vpop.f32.mrb[18].mxu1 }
 0x29f   : > { %v996_v37 = vadd.f32 %v1479_v6, %v835_v4  ;;  %v956_v8 = vpop.f32.mrb[19].mxu1 }
 0x2a0   : > { %v995_v9 = vadd.f32 %v956_v8, %v834_v35  ;;  %v1028_v24 = vld [vmem:[#allocation2 + $0x38] sm:$0xff] (!%p1216_p4) }
 0x2a1   : > { %1012 = vst [vmem:[#allocation2 + $0x58] sm:$0xff] %v996_v37  ;;  %v1027_v54 = vld [vmem:[#allocation2 + $0x30] sm:$0xff] (!%p1216_p4)  ;;  %1044 = vst [vmem:[#allocation11 + $0x38] sm:$0xff] (!%p1216_p4), %v1028_v24 }
 0x2a2   : > { %1011 = vst [vmem:[#allocation2 + $0x50] sm:$0xff] %v995_v9  ;;  %v1482_v13 = vpop.f32.mrb[20].mxu1  ;;  %1043 = vst [vmem:[#allocation11 + $0x30] sm:$0xff] (!%p1216_p4), %v1027_v54 }
 0x2a3   : > { %v998_v49 = vadd.f32 %v1482_v13, %v837_v45  ;;  %v966_v14 = vpop.f32.mrb[21].mxu1 }
 0x2a4   : > { %v997_v41 = vadd.f32 %v966_v14, %v836_v12  ;;  %1020 = sbr.rel (%p1216_p4) target bundleno = 691 (0x2b3), region = 60  ;;  %v1030_v5 = vld [vmem:[#allocation2 + $0x48] sm:$0xff] (!%p1216_p4) }
 0x2a5   : > { %1014 = vst [vmem:[#allocation2 + $0x68] sm:$0xff] %v998_v49  ;;  %v1029_v61 = vld [vmem:[#allocation2 + $0x40] sm:$0xff] (!%p1216_p4)  ;;  %1046 = vst [vmem:[#allocation11 + $0x48] sm:$0xff] (!%p1216_p4), %v1030_v5 }
 0x2a6   : > { %1013 = vst [vmem:[#allocation2 + $0x60] sm:$0xff] %v997_v41  ;;  %v1485_v18 = vpop.f32.mrb[22].mxu1  ;;  %1045 = vst [vmem:[#allocation11 + $0x40] sm:$0xff] (!%p1216_p4), %v1029_v61 }
 0x2a7   : > { %v1000_v19 = vadd.f32 %v1485_v18, %v839_v16  ;;  %v976_v55 = vpop.f32.mrb[23].mxu1 }
 0x2a8   : > { %v999_v44 = vadd.f32 %v976_v55, %v838_v17  ;;  %v1032_v11 = vld [vmem:[#allocation2 + $0x58] sm:$0xff] (!%p1216_p4) }
 0x2a9   : > { %1016 = vst [vmem:[#allocation2 + $0x78] sm:$0xff] %v1000_v19  ;;  %v1031_v30 = vld [vmem:[#allocation2 + $0x50] sm:$0xff] (!%p1216_p4)  ;;  %1048 = vst [vmem:[#allocation11 + $0x58] sm:$0xff] (!%p1216_p4), %v1032_v11 }
 0x2aa   : > { %1015 = vst [vmem:[#allocation2 + $0x70] sm:$0xff] %v999_v44  ;;  %1047 = vst [vmem:[#allocation11 + $0x50] sm:$0xff] (!%p1216_p4), %v1031_v30 }
 0x2ac   : > { %v1034_v0 = vld [vmem:[#allocation2 + $0x68] sm:$0xff] }
 0x2ad   : > { %v1033_v25 = vld [vmem:[#allocation2 + $0x60] sm:$0xff]  ;;  %1050 = vst [vmem:[#allocation11 + $0x68] sm:$0xff] %v1034_v0 }
 0x2ae   : > { %1049 = vst [vmem:[#allocation11 + $0x60] sm:$0xff] %v1033_v25 }
 0x2b0   : > { %v1036_v15 = vld [vmem:[#allocation2 + $0x78] sm:$0xff] }
 0x2b1   : > { %v1035_v7 = vld [vmem:[#allocation2 + $0x70] sm:$0xff]  ;;  %1052 = vst [vmem:[#allocation11 + $0x78] sm:$0xff] %v1036_v15 }
 0x2b2   : > { %1051 = vst [vmem:[#allocation11 + $0x70] sm:$0xff] %v1035_v7 }
 0x2b3 PF: > { %p1629_p7 = scmp.eq.s32.totalorder %s2102_s30, 1  ;;  %s1967_s18 = smov [#allocation11]  }
 0x2b4   : > { %s1062_s5 = sshll.u32 %s1967_s18, 4  ;;  %s1063_s5 = int_to_ptr.vmem [resolvable:$true] %s1062_s5 }
 0x2b5   : > { %s1869_s23 = scalar_lea.vmem %s1063_s5, 2048  ;;  %p1876_p6 = scmp.lt.s32.totalorder %s1063_s5, %s1063_s5 }
 0x2b6   : > { %p1870_p9 = scmp.ne.s32.totalorder %s1063_s5, %s1869_s23  ;;  %p1877_p13 = scmp.lt.s32.totalorder %s1869_s23, %s1869_s23 }
 0x2b8   : > { %p1871_p12 = pnand %p1870_p9, %p1629_p7  ;;  %p1878_p3 = por %p1877_p13, %p1876_p6 }
 0x2ba   : > { %p1872_p10 = pneg %p1871_p12 }
 0x2bc   : > { %p1879_p2 = pnand %p1878_p3, %p1872_p10 }
 0x2be   : > { %1882 = shalt.err (!%p1879_p2)
}
 0x2bf   : > { %s1883_s29 = scalar_lea.hbm %s2448_s4, 2048 }
 0x2c0   : > { %p1884_p8 = scmp.ne.s32.totalorder %s2448_s4, %s1883_s29  ;;  %p1889_p0 = scmp.lt.u32.totalorder %s1883_s29, %s2448_s4 }
 0x2c2   : > { %p1885_p5 = pnand %p1884_p8, %p1629_p7 }
 0x2c4   : > { %p1886_p11 = pneg %p1885_p5 }
 0x2c6   : > { %p1891_p1 = pnand %p1889_p0, %p1886_p11 }
 0x2c8   : > { %1894 = shalt.err (!%p1891_p1)
}
 0x2c9   : > { %s1968_s25 = smov 128   ;;  %s1969_s10 = smov 8  }
 0x2ca   : > { %1609 = dma.vmem_to_hbm [thread:$0]  (%p1629_p7), %s1063_s5, 2048, %s2448_s4, [#allocation5], %s1968_s25, %s1968_s25, %s1969_s10  }
 0x2cb   : > { %1932 = dma.done.wait (%p1629_p7), [#allocation5], 2048  }
 0x2cc   : > { %1934 = vsyncadd (%p1629_p7), [#allocation5], 4294965248 }
 0x2cd PF: > { %s22_s20 = sadd.s32 1, %s1957_s20   ;;  %s2480_s15 = smov %s1941_s16 }
 0x2ce   : > { %p19_p4 = scmp.ge.s32.totalorder %s22_s20, 4   ;;  %s2481_s16 = smov %s1945_s17 }
 0x2cf   : > { %s2482_s17 = smov %s2042_s27  ;;  %s2483_s18 = smov %s1953_s19 }
 0x2d0   : > { %s2484_s19 = smov %s2486_s21  ;;  %21 = sbr.rel (!%p19_p4) target bundleno = 11 (0xb), region = 112 }
 0x2d7   :  { %1078 = vsyncpa [#allocation4], 1 }
 0x2d8   :  { %1080 = vsyncpa [#allocation4 + $0x1], 1 }
 0x2d9   :  { %1081 = vsyncpa [#allocation7], 1 }
 0x2da   :  { %1083 = vsyncpa [#allocation7 + $0x1], 1 }
 0x2db   :  { %1084 = vsyncpa [#allocation10], 1 }
 0x2dc   :  { %1086 = vsyncpa [#allocation10 + $0x1], 1 }
 0x2dd   :  { %1087 = vsyncpa [#allocation5], 1 }
 0x2de   :  { %1089 = vsyncpa [#allocation5 + $0x1], 1 }

</bundles_post_ra>
